<compile_context>
chip_gen: v7x
topology: tpu7x:2x2x1
jax: 0.10.0
libtpu: 0.0.40
codegen_flags: <defaults>
</compile_context>

<pallas_src>
import functools

import jax
import jax.numpy as jnp
from jax.experimental import pallas as pl
from jax.experimental.pallas import tpu as pltpu


def _leaky_relu(x, slope=0.1):
    # Equivalent to jnp.where(x > 0, x, slope * x) for slope in (0, 1).
    return jnp.maximum(x, slope * x)


def _round_up(x, m):
    return (x + m - 1) // m * m


# --------------------------------------------------------------------------- #
# Kernel
# --------------------------------------------------------------------------- #
def mlp_kernel(
    x_ref,
    w1_ref, b1_ref,
    w2_ref, b2_ref,
    w3_ref, b3_ref,
    w4_ref, b4_ref,
    o_ref,
):
    x = x_ref[...].astype(jnp.float32)

    # --- LayerNorm normalize step (eps=1e-5); affine is folded into fc1 ------
    # Two-pass variance: mean((x - mean)^2), matching PyTorch LayerNorm.
    mean = jnp.mean(x, axis=-1, keepdims=True)
    centered = x - mean
    var = jnp.mean(centered * centered, axis=-1, keepdims=True)
    x = centered * jax.lax.rsqrt(var + 1e-5)

    mm_dtype = w1_ref.dtype  # bf16 MXU operands; f32 accumulation.

    # --- fc1 (LN affine + BN1 pre-folded) -> LeakyReLU (dropout = identity) --
    h = jnp.dot(x.astype(mm_dtype), w1_ref[...], preferred_element_type=jnp.float32)
    h = _leaky_relu(h + b1_ref[...])

    # --- fc2 (BN2 folded) -> LeakyReLU ---------------------------------------
    h = jnp.dot(h.astype(mm_dtype), w2_ref[...], preferred_element_type=jnp.float32)
    h = _leaky_relu(h + b2_ref[...])

    # --- fc3 (BN3 folded) -> LeakyReLU ---------------------------------------
    h = jnp.dot(h.astype(mm_dtype), w3_ref[...], preferred_element_type=jnp.float32)
    h = _leaky_relu(h + b3_ref[...])

    # --- fc4 (logits) ---------------------------------------------------------
    # TODO(synk): num_classes=3 (<128 lanes) => masked partial stores; a
    # batch-on-lanes (transposed) layout would make this lane-dense, but the
    # x read dominates HBM traffic for this model so it is left row-major.
    o_ref[...] = (
        jnp.dot(h.astype(mm_dtype), w4_ref[...], preferred_element_type=jnp.float32)
        + b4_ref[...]
    ).astype(o_ref.dtype)


# --------------------------------------------------------------------------- #
# Host-side folding and wrapper
# --------------------------------------------------------------------------- #
def fold_params(p, mm_dtype=jnp.bfloat16):
    """Fold LayerNorm affine + eval-mode BatchNorm into the linear layers."""
    # (x_n * g + b_ln) @ W1 + b1  ==  x_n @ (g^T * W1) + (b_ln @ W1 + b1)
    w1 = p["w1"] * p["ln_g"][0][:, None]
    b1 = p["ln_b"] @ p["w1"] + p["b1"]

    def bn_fold(w, b, s, t):
        # (x @ W + b) * s + t  ==  x @ (W * s) + (b * s + t)
        return (w * s).astype(mm_dtype), (b * s + t).astype(jnp.float32)

    w1, b1 = bn_fold(w1, b1, p["bn1_scale"], p["bn1_shift"])
    w2, b2 = bn_fold(p["w2"], p["b2"], p["bn2_scale"], p["bn2_shift"])
    w3, b3 = bn_fold(p["w3"], p["b3"], p["bn3_scale"], p["bn3_shift"])
    w4 = p["w4"].astype(mm_dtype)
    b4 = p["b4"].astype(jnp.float32)
    return (w1, b1, w2, b2, w3, b3, w4, b4)


def _pick_tile(batch, block_b):
    """MXU-aligned batch tile; keep >= 2 grid steps for v7x dual-TC sharding."""
    b128 = _round_up(batch, 128)
    if b128 <= 256 or b128 > block_b:
        return min(block_b, b128)
    # Whole batch would fit in one oversized tile: split into two so the
    # "parallel" grid axis can shard across both v7x TensorCores.
    return _round_up(pl.cdiv(b128, 2), 128)


def enhanced_stock_predictor(x, params, *, block_b=2048, mm_dtype=jnp.bfloat16):
    """x: (B, input_dim) float32.  params: dict (see init_params)."""
    B, F = x.shape
    num_classes = params["w4"].shape[1]
    block_b = _round_up(block_b, 128)

    weights = fold_params(params, mm_dtype)

    tb = _pick_tile(B, block_b)
    b_pad = _round_up(B, tb)
    if b_pad != B:
        x = jnp.pad(x, ((0, b_pad - B), (0, 0)))
    grid = (b_pad // tb,)

    def const_spec(arr):
        # Full-array block, same block every grid step -> stays VMEM-resident.
        return pl.BlockSpec(arr.shape, lambda i: (0,) * arr.ndim)

    out = pl.pallas_call(
        mlp_kernel,
        out_shape=jax.ShapeDtypeStruct((b_pad, num_classes), jnp.float32),
        grid=grid,
        in_specs=[pl.BlockSpec((tb, F), lambda i: (i, 0))]
        + [const_spec(a) for a in weights],
        out_specs=pl.BlockSpec((tb, num_classes), lambda i: (i, 0)),
        compiler_params=pltpu.CompilerParams(
            dimension_semantics=("parallel",),   # v7x: shard tiles over 2 TCs
            vmem_limit_bytes=32 * 1024 * 1024,   # plenty; working set ~1-6 MiB
        ),
    )(x, *weights)
    return out[:B]


# --------------------------------------------------------------------------- #
# Parameters and references
# --------------------------------------------------------------------------- #
def init_params(key, input_dim=24, h1=128, h2=64, h3=32, num_classes=3):
    """Deterministic synthetic parameters matching the PyTorch module's shapes."""
    ks = jax.random.split(key, 16)
    eps = 1e-5

    def linear(kw, kb, fan_in, fan_out):
        bound = 1.0 / jnp.sqrt(fan_in)
        w = jax.random.uniform(kw, (fan_in, fan_out), jnp.float32, -bound, bound)
        b = jax.random.uniform(kb, (1, fan_out), jnp.float32, -bound, bound)
        return w, b

    def bn_fold(kg, kb, dim):
        # Eval-mode BN: y = (x - running_mean) / sqrt(running_var + eps) * gamma + beta
        gamma = 1.0 + 0.01 * jax.random.normal(kg, (1, dim), jnp.float32)
        beta = 0.01 * jax.random.normal(kb, (1, dim), jnp.float32)
        running_mean = jnp.zeros((1, dim), jnp.float32)
        running_var = jnp.ones((1, dim), jnp.float32)
        scale = gamma / jnp.sqrt(running_var + eps)
        shift = beta - running_mean * scale
        return scale, shift

    w1, b1 = linear(ks[0], ks[1], input_dim, h1)
    w2, b2 = linear(ks[2], ks[3], h1, h2)
    w3, b3 = linear(ks[4], ks[5], h2, h3)
    w4, b4 = linear(ks[6], ks[7], h3, num_classes)
    s1, t1 = bn_fold(ks[8], ks[9], h1)
    s2, t2 = bn_fold(ks[10], ks[11], h2)
    s3, t3 = bn_fold(ks[12], ks[13], h3)

    return dict(
        ln_g=1.0 + 0.05 * jax.random.normal(ks[14], (1, input_dim), jnp.float32),
        ln_b=0.05 * jax.random.normal(ks[15], (1, input_dim), jnp.float32),
        w1=w1, b1=b1, bn1_scale=s1, bn1_shift=t1,
        w2=w2, b2=b2, bn2_scale=s2, bn2_shift=t2,
        w3=w3, b3=b3, bn3_scale=s3, bn3_shift=t3,
        w4=w4, b4=b4,
    )


def reference_forward_f32(x, p):
    """Pure-JAX f32 reference matching the PyTorch module (eval mode)."""
    mean = jnp.mean(x, axis=-1, keepdims=True)
    var = jnp.mean((x - mean) ** 2, axis=-1, keepdims=True)
    h = (x - mean) * jax.lax.rsqrt(var + 1e-5) * p["ln_g"] + p["ln_b"]

    def block(h, w, b, s, t):
        y = h @ w + b            # Linear
        y = y * s + t            # BatchNorm1d (eval, running stats)
        return jnp.maximum(y, 0.1 * y)  # LeakyReLU(0.1); dropout = identity

    h = block(h, p["w1"], p["b1"], p["bn1_scale"], p["bn1_shift"])
    h = block(h, p["w2"], p["b2"], p["bn2_scale"], p["bn2_shift"])
    h = block(h, p["w3"], p["b3"], p["bn3_scale"], p["bn3_shift"])
    return h @ p["w4"] + p["b4"]


def reference_forward_folded(x, p, mm_dtype=jnp.bfloat16):
    """Reference mirroring the kernel's exact folding + bf16 matmul precision."""
    w1, b1, w2, b2, w3, b3, w4, b4 = fold_params(p, mm_dtype)
    mean = jnp.mean(x, axis=-1, keepdims=True)
    var = jnp.mean((x - mean) ** 2, axis=-1, keepdims=True)
    h = (x - mean) * jax.lax.rsqrt(var + 1e-5)

    def mm(a, w):
        return jnp.dot(a.astype(mm_dtype), w, preferred_element_type=jnp.float32)

    h = _leaky_relu(mm(h, w1) + b1)
    h = _leaky_relu(mm(h, w2) + b2)
    h = _leaky_relu(mm(h, w3) + b3)
    return mm(h, w4) + b4


# --------------------------------------------------------------------------- #
# Main
# --------------------------------------------------------------------------- #
if __name__ == "__main__":
    key = jax.random.PRNGKey(0)
    k_x, k_p, k_x2 = jax.random.split(key, 3)

    B, input_dim = 8, 24
    x = jax.random.normal(k_x, (B, input_dim), jnp.float32)
    params = init_params(k_p, input_dim=input_dim)

    fwd = jax.jit(functools.partial(enhanced_stock_predictor, block_b=2048))
    out = jax.block_until_ready(fwd(x, params))

    ref_bf16 = reference_forward_folded(x, params)   # same precision as kernel
    ref_f32 = reference_forward_f32(x, params)       # module math

    assert out.shape == (B, 3), out.shape
    assert jnp.allclose(out, ref_bf16, atol=5e-3, rtol=5e-3), "mismatch vs bf16 ref"
    assert jnp.allclose(out, ref_f32, atol=5e-2, rtol=5e-2), "mismatch vs f32 ref"

    # Second, slightly larger batch: exercises padding and a 2-step grid.
    B2 = 260
    x2 = jax.random.normal(k_x2, (B2, input_dim), jnp.float32)
    out2 = jax.block_until_ready(fwd(x2, params))
    ref2 = reference_forward_f32(x2, params)
    assert out2.shape == (B2, 3), out2.shape
    assert jnp.allclose(out2, ref2, atol=5e-2, rtol=5e-2), "mismatch (tiled batch)"

    print("KERNEL_OK")
</pallas_src>

<mosaic_0001>
module attributes {stable_mosaic.version = 11 : i64} {
  func.func @mlp_kernel(%arg0: i32, %arg1: memref<128x24xf32, #tpu.memory_space<vmem>>, %arg2: memref<24x128xbf16, #tpu.memory_space<vmem>>, %arg3: memref<1x128xf32, #tpu.memory_space<vmem>>, %arg4: memref<128x64xbf16, #tpu.memory_space<vmem>>, %arg5: memref<1x64xf32, #tpu.memory_space<vmem>>, %arg6: memref<64x32xbf16, #tpu.memory_space<vmem>>, %arg7: memref<1x32xf32, #tpu.memory_space<vmem>>, %arg8: memref<32x3xbf16, #tpu.memory_space<vmem>>, %arg9: memref<1x3xf32, #tpu.memory_space<vmem>>, %arg10: memref<128x3xf32, #tpu.memory_space<vmem>>) attributes {dimension_semantics = [#tpu.dimension_semantics<parallel>], iteration_bounds = array<i64: 1>, scalar_prefetch = 0 : i64, scratch_operands = 0 : i64, tpu.core_type = #tpu.core_type<tc>, window_params = [{transform_indices = @transform_0, window_bounds = array<i64: 128, 24>}, {pipeline_mode = #tpu.pipeline_mode<synchronous>, transform_indices = @transform_1, window_bounds = array<i64: 24, 128>}, {pipeline_mode = #tpu.pipeline_mode<synchronous>, transform_indices = @transform_2, window_bounds = array<i64: 1, 128>}, {pipeline_mode = #tpu.pipeline_mode<synchronous>, transform_indices = @transform_3, window_bounds = array<i64: 128, 64>}, {pipeline_mode = #tpu.pipeline_mode<synchronous>, transform_indices = @transform_4, window_bounds = array<i64: 1, 64>}, {pipeline_mode = #tpu.pipeline_mode<synchronous>, transform_indices = @transform_5, window_bounds = array<i64: 64, 32>}, {pipeline_mode = #tpu.pipeline_mode<synchronous>, transform_indices = @transform_6, window_bounds = array<i64: 1, 32>}, {pipeline_mode = #tpu.pipeline_mode<synchronous>, transform_indices = @transform_7, window_bounds = array<i64: 32, 3>}, {pipeline_mode = #tpu.pipeline_mode<synchronous>, transform_indices = @transform_8, window_bounds = array<i64: 1, 3>}, {transform_indices = @transform_9, window_bounds = array<i64: 128, 3>}]} {
    %c0 = arith.constant 0 : index
    %c0_0 = arith.constant 0 : index
    %0 = vector.load %arg1[%c0, %c0_0] : memref<128x24xf32, #tpu.memory_space<vmem>>, vector<128x24xf32>
    %cst = arith.constant dense<0.000000e+00> : vector<128xf32>
    %1 = vector.multi_reduction <add>, %0, %cst [1] : vector<128x24xf32> to vector<128xf32>
    %2 = vector.shape_cast %1 : vector<128xf32> to vector<128x1xf32>
    %cst_1 = arith.constant 2.400000e+01 : f32
    %3 = vector.broadcast %cst_1 : f32 to vector<128x1xf32>
    %4 = arith.divf %2, %3 : vector<128x1xf32>
    %5 = vector.broadcast %4 : vector<128x1xf32> to vector<128x24xf32>
    %6 = arith.subf %0, %5 : vector<128x24xf32>
    %7 = arith.mulf %6, %6 : vector<128x24xf32>
    %cst_2 = arith.constant dense<0.000000e+00> : vector<128xf32>
    %8 = vector.multi_reduction <add>, %7, %cst_2 [1] : vector<128x24xf32> to vector<128xf32>
    %9 = vector.shape_cast %8 : vector<128xf32> to vector<128x1xf32>
    %cst_3 = arith.constant 2.400000e+01 : f32
    %10 = vector.broadcast %cst_3 : f32 to vector<128x1xf32>
    %11 = arith.divf %9, %10 : vector<128x1xf32>
    %cst_4 = arith.constant 9.99999974E-6 : f32
    %12 = vector.broadcast %cst_4 : f32 to vector<128x1xf32>
    %13 = arith.addf %11, %12 : vector<128x1xf32>
    %14 = math.rsqrt %13 : vector<128x1xf32>
    %15 = vector.broadcast %14 : vector<128x1xf32> to vector<128x24xf32>
    %16 = arith.mulf %6, %15 : vector<128x24xf32>
    %17 = arith.truncf %16 : vector<128x24xf32> to vector<128x24xbf16>
    %c0_5 = arith.constant 0 : index
    %c0_6 = arith.constant 0 : index
    %18 = vector.load %arg2[%c0_5, %c0_6] : memref<24x128xbf16, #tpu.memory_space<vmem>>, vector<24x128xbf16>
    %cst_7 = arith.constant dense<0.000000e+00> : vector<128x128xf32>
    %19 = tpu.matmul %17, %18, %cst_7 {dimension_numbers = #tpu.dot_dimension_numbers<[1], [0], [0], [1], [0, 0, 1, 1], [], []>} : vector<128x24xbf16>, vector<24x128xbf16>, vector<128x128xf32> -> vector<128x128xf32>
    %c0_8 = arith.constant 0 : index
    %c0_9 = arith.constant 0 : index
    %20 = vector.load %arg3[%c0_8, %c0_9] : memref<1x128xf32, #tpu.memory_space<vmem>>, vector<1x128xf32>
    %21 = vector.broadcast %20 : vector<1x128xf32> to vector<128x128xf32>
    %22 = arith.addf %19, %21 : vector<128x128xf32>
    %cst_10 = arith.constant 1.000000e-01 : f32
    %23 = vector.broadcast %cst_10 : f32 to vector<128x128xf32>
    %24 = arith.mulf %23, %22 : vector<128x128xf32>
    %25 = arith.maximumf %22, %24 : vector<128x128xf32>
    %26 = arith.truncf %25 : vector<128x128xf32> to vector<128x128xbf16>
    %c0_11 = arith.constant 0 : index
    %c0_12 = arith.constant 0 : index
    %27 = vector.load %arg4[%c0_11, %c0_12] : memref<128x64xbf16, #tpu.memory_space<vmem>>, vector<128x64xbf16>
    %cst_13 = arith.constant dense<0.000000e+00> : vector<128x64xf32>
    %28 = tpu.matmul %26, %27, %cst_13 {dimension_numbers = #tpu.dot_dimension_numbers<[1], [0], [0], [1], [0, 0, 1, 1], [], []>} : vector<128x128xbf16>, vector<128x64xbf16>, vector<128x64xf32> -> vector<128x64xf32>
    %c0_14 = arith.constant 0 : index
    %c0_15 = arith.constant 0 : index
    %29 = vector.load %arg5[%c0_14, %c0_15] : memref<1x64xf32, #tpu.memory_space<vmem>>, vector<1x64xf32>
    %30 = vector.broadcast %29 : vector<1x64xf32> to vector<128x64xf32>
    %31 = arith.addf %28, %30 : vector<128x64xf32>
    %cst_16 = arith.constant 1.000000e-01 : f32
    %32 = vector.broadcast %cst_16 : f32 to vector<128x64xf32>
    %33 = arith.mulf %32, %31 : vector<128x64xf32>
    %34 = arith.maximumf %31, %33 : vector<128x64xf32>
    %35 = arith.truncf %34 : vector<128x64xf32> to vector<128x64xbf16>
    %c0_17 = arith.constant 0 : index
    %c0_18 = arith.constant 0 : index
    %36 = vector.load %arg6[%c0_17, %c0_18] : memref<64x32xbf16, #tpu.memory_space<vmem>>, vector<64x32xbf16>
    %cst_19 = arith.constant dense<0.000000e+00> : vector<128x32xf32>
    %37 = tpu.matmul %35, %36, %cst_19 {dimension_numbers = #tpu.dot_dimension_numbers<[1], [0], [0], [1], [0, 0, 1, 1], [], []>} : vector<128x64xbf16>, vector<64x32xbf16>, vector<128x32xf32> -> vector<128x32xf32>
    %c0_20 = arith.constant 0 : index
    %c0_21 = arith.constant 0 : index
    %38 = vector.load %arg7[%c0_20, %c0_21] : memref<1x32xf32, #tpu.memory_space<vmem>>, vector<1x32xf32>
    %39 = vector.broadcast %38 : vector<1x32xf32> to vector<128x32xf32>
    %40 = arith.addf %37, %39 : vector<128x32xf32>
    %cst_22 = arith.constant 1.000000e-01 : f32
    %41 = vector.broadcast %cst_22 : f32 to vector<128x32xf32>
    %42 = arith.mulf %41, %40 : vector<128x32xf32>
    %43 = arith.maximumf %40, %42 : vector<128x32xf32>
    %44 = arith.truncf %43 : vector<128x32xf32> to vector<128x32xbf16>
    %c0_23 = arith.constant 0 : index
    %c0_24 = arith.constant 0 : index
    %45 = vector.load %arg8[%c0_23, %c0_24] : memref<32x3xbf16, #tpu.memory_space<vmem>>, vector<32x3xbf16>
    %cst_25 = arith.constant dense<0.000000e+00> : vector<128x3xf32>
    %46 = tpu.matmul %44, %45, %cst_25 {dimension_numbers = #tpu.dot_dimension_numbers<[1], [0], [0], [1], [0, 0, 1, 1], [], []>} : vector<128x32xbf16>, vector<32x3xbf16>, vector<128x3xf32> -> vector<128x3xf32>
    %c0_26 = arith.constant 0 : index
    %c0_27 = arith.constant 0 : index
    %47 = vector.load %arg9[%c0_26, %c0_27] : memref<1x3xf32, #tpu.memory_space<vmem>>, vector<1x3xf32>
    %48 = vector.broadcast %47 : vector<1x3xf32> to vector<128x3xf32>
    %49 = arith.addf %46, %48 : vector<128x3xf32>
    %c0_28 = arith.constant 0 : index
    %c0_29 = arith.constant 0 : index
    %50 = vector.load %arg10[%c0_28, %c0_29] : memref<128x3xf32, #tpu.memory_space<vmem>>, vector<128x3xf32>
    tpu.vector_store %arg10[%c0_28, %c0_29], %49 {strides = array<i32>} : memref<128x3xf32, #tpu.memory_space<vmem>>, vector<128x3xf32>,
    return
  }
  func.func @transform_0(%arg0: i32) -> (i32, i32) {
    %c0_i32 = arith.constant 0 : i32
    %c0_i32_0 = arith.constant 0 : i32
    return %arg0, %c0_i32 : i32, i32
  }
  func.func @transform_1(%arg0: i32) -> (i32, i32) {
    %c0_i32 = arith.constant 0 : i32
    %c0_i32_0 = arith.constant 0 : i32
    %c0_i32_1 = arith.constant 0 : i32
    return %c0_i32, %c0_i32_0 : i32, i32
  }
  func.func @transform_2(%arg0: i32) -> (i32, i32) {
    %c0_i32 = arith.constant 0 : i32
    %c0_i32_0 = arith.constant 0 : i32
    %c0_i32_1 = arith.constant 0 : i32
    return %c0_i32, %c0_i32_0 : i32, i32
  }
  func.func @transform_3(%arg0: i32) -> (i32, i32) {
    %c0_i32 = arith.constant 0 : i32
    %c0_i32_0 = arith.constant 0 : i32
    %c0_i32_1 = arith.constant 0 : i32
    return %c0_i32, %c0_i32_0 : i32, i32
  }
  func.func @transform_4(%arg0: i32) -> (i32, i32) {
    %c0_i32 = arith.constant 0 : i32
    %c0_i32_0 = arith.constant 0 : i32
    %c0_i32_1 = arith.constant 0 : i32
    return %c0_i32, %c0_i32_0 : i32, i32
  }
  func.func @transform_5(%arg0: i32) -> (i32, i32) {
    %c0_i32 = arith.constant 0 : i32
    %c0_i32_0 = arith.constant 0 : i32
    %c0_i32_1 = arith.constant 0 : i32
    return %c0_i32, %c0_i32_0 : i32, i32
  }
  func.func @transform_6(%arg0: i32) -> (i32, i32) {
    %c0_i32 = arith.constant 0 : i32
    %c0_i32_0 = arith.constant 0 : i32
    %c0_i32_1 = arith.constant 0 : i32
    return %c0_i32, %c0_i32_0 : i32, i32
  }
  func.func @transform_7(%arg0: i32) -> (i32, i32) {
    %c0_i32 = arith.constant 0 : i32
    %c0_i32_0 = arith.constant 0 : i32
    %c0_i32_1 = arith.constant 0 : i32
    return %c0_i32, %c0_i32_0 : i32, i32
  }
  func.func @transform_8(%arg0: i32) -> (i32, i32) {
    %c0_i32 = arith.constant 0 : i32
    %c0_i32_0 = arith.constant 0 : i32
    %c0_i32_1 = arith.constant 0 : i32
    return %c0_i32, %c0_i32_0 : i32, i32
  }
  func.func @transform_9(%arg0: i32) -> (i32, i32) {
    %c0_i32 = arith.constant 0 : i32
    %c0_i32_0 = arith.constant 0 : i32
    return %arg0, %c0_i32 : i32, i32
  }
}

</mosaic_0001>

<bundles_post_ra>
// kernel: enhanced_stock_predictor.1
= control target key start
LH: loop header
LB: loop body
LE: loop exit
PB: predicated region body
PF: predicated region fallthrough
CT: control target
= control target key end

     0   :  { %vm49_vm0 = vcmask 195584   ;;  %vm310_vm1 = vcmask 1043456   ;;  %vm698_vm2 = vcmask 523264   ;;  %vm883_vm3 = vcmask 261120   ;;  %s1719_s0 = inlined_call_operand.vmem [shape: f32[128,24], index: 0, kind: input, shape index: {}]   ;;  %s1720_s1 = inlined_call_operand.vmem [shape: bf16[24,128], index: 1, kind: input, shape index: {}]   ;;  %s1721_s3 = inlined_call_operand.vmem [shape: bf16[128,64], index: 3, kind: input, shape index: {}]   ;;  %s1722_s5 = inlined_call_operand.vmem [shape: bf16[64,32], index: 5, kind: input, shape index: {}]   ;;  %s1723_s2 = inlined_call_operand.vmem [shape: f32[1,128], index: 2, kind: input, shape index: {}]   ;;  %s1724_s7 = inlined_call_operand.vmem [shape: bf16[32,3], index: 7, kind: input, shape index: {}]   ;;  %s1725_s4 = inlined_call_operand.vmem [shape: f32[1,64], index: 4, kind: input, shape index: {}]   ;;  %s1726_s6 = inlined_call_operand.vmem [shape: f32[1,32], index: 6, kind: input, shape index: {}]   ;;  %s1727_s8 = inlined_call_operand.vmem [shape: f32[1,3], index: 8, kind: input, shape index: {}]   ;;  %s1728_s9 = inlined_call_operand.vmem [shape: f32[128,3], index: 9, kind: output, shape index: {}]  }
   0x1   :  { %v33_v0 = vld [vmem:[%s1719_s0] sm:$0xff]  ;;  %v35_v1 = vld [vmem:[%s1719_s0 + $0x10] sm:$0xff]  ;;  %v34_v2 = vld [vmem:[%s1719_s0 + $0x8] sm:$0xff]  ;;  %vm1005_vm4 = vcmask 23552  }
   0x2   :  { %v50_v3 = vsel %vm49_vm0, %v33_v0, 0.0  ;;  %v56_v4 = vsel %vm49_vm0, %v35_v1, 0.0  ;;  %v36_v5 = vld [vmem:[%s1719_s0 + $0x18] sm:$0xff]  ;;  %v53_v6 = vsel %vm49_vm0, %v34_v2, 0.0  ;;  %v37_v8 = vld [vmem:[%s1719_s0 + $0x20] sm:$0xff]  ;;  %v38_v9 = vld [vmem:[%s1719_s0 + $0x28] sm:$0xff] }
   0x3   :  { %51 = vadd.xlane.f32.xlu0 %v50_v3  ;;  %57 = vadd.xlane.f32.xlu1 %v56_v4  ;;  %v59_v7 = vsel %vm49_vm0, %v36_v5, 0.0  ;;  %v62_v10 = vsel %vm49_vm0, %v37_v8, 0.0  ;;  %v65_v11 = vsel %vm49_vm0, %v38_v9, 0.0  ;;  %v1344_v12 = vld [vmem:[%s1719_s0 + $0x30] sm:$0xff]  ;;  %v1349_v13 = vld [vmem:[%s1719_s0 + $0x38] sm:$0xff]  ;;  %v1358_v16 = vld [vmem:[%s1719_s0 + $0x40] sm:$0xff] }
   0x4   :  { %v68_v14 = vsel %vm49_vm0, %v1344_v12, 0.0  ;;  %v71_v15 = vsel %vm49_vm0, %v1349_v13, 0.0  ;;  %v1363_v17 = vld [vmem:[%s1719_s0 + $0x48] sm:$0xff]  ;;  %v74_v18 = vsel %vm49_vm0, %v1358_v16, 0.0  ;;  %v1372_v20 = vld [vmem:[%s1719_s0 + $0x50] sm:$0xff]  ;;  %v1377_v21 = vld [vmem:[%s1719_s0 + $0x58] sm:$0xff] }
   0x5   :  { %v77_v19 = vsel %vm49_vm0, %v1363_v17, 0.0  ;;  %v80_v22 = vsel %vm49_vm0, %v1372_v20, 0.0  ;;  %v83_v23 = vsel %vm49_vm0, %v1377_v21, 0.0  ;;  %v1386_v24 = vld [vmem:[%s1719_s0 + $0x60] sm:$0xff]  ;;  %v1391_v25 = vld [vmem:[%s1719_s0 + $0x68] sm:$0xff]  ;;  %v1400_v28 = vld [vmem:[%s1719_s0 + $0x70] sm:$0xff] }
   0x6   :  { %v86_v26 = vsel %vm49_vm0, %v1386_v24, 0.0  ;;  %v89_v27 = vsel %vm49_vm0, %v1391_v25, 0.0  ;;  %v1405_v29 = vld [vmem:[%s1719_s0 + $0x78] sm:$0xff]  ;;  %v92_v30 = vsel %vm49_vm0, %v1400_v28, 0.0 }
   0x7   :  { %54 = vadd.xlane.f32.xlu0 %v53_v6  ;;  %60 = vadd.xlane.f32.xlu1 %v59_v7  ;;  %v95_v31 = vsel %vm49_vm0, %v1405_v29, 0.0 }
   0xb   :  { %63 = vadd.xlane.f32.xlu0 %v62_v10  ;;  %66 = vadd.xlane.f32.xlu1 %v65_v11 }
   0xf   :  { %69 = vadd.xlane.f32.xlu0 %v68_v14  ;;  %72 = vadd.xlane.f32.xlu1 %v71_v15 }
  0x13   :  { %75 = vadd.xlane.f32.xlu0 %v74_v18  ;;  %78 = vadd.xlane.f32.xlu1 %v77_v19 }
  0x17   :  { %81 = vadd.xlane.f32.xlu0 %v80_v22  ;;  %84 = vadd.xlane.f32.xlu1 %v83_v23 }
  0x1b   :  { %87 = vadd.xlane.f32.xlu0 %v86_v26  ;;  %90 = vadd.xlane.f32.xlu1 %v89_v27 }
  0x1f   :  { %93 = vadd.xlane.f32.xlu0 %v92_v30  ;;  %96 = vadd.xlane.f32.xlu1 %v95_v31 }
  0x90   :  { %v52_v32 = vpop.xlane.xlu0 %51  ;;  %v58_v33 = vpop.xlane.xlu1 %57 }
  0x91   :  { %v99_v34 = vmul.f32 0.041666668, %v52_v32  ;;  %v101_v35 = vmul.f32 0.041666668, %v58_v33 }
  0x93   :  { %v1411_v36 = vsub.f32 %v33_v0, %v99_v34  ;;  %v1413_v37 = vsub.f32 %v35_v1, %v101_v35 }
  0x94   :  { %v55_v38 = vpop.xlane.xlu0 %54  ;;  %v61_v39 = vpop.xlane.xlu1 %60 }
  0x95   :  { %v100_v40 = vmul.f32 0.041666668, %v55_v38  ;;  %v102_v41 = vmul.f32 0.041666668, %v61_v39  ;;  %v131_v42 = vmul.f32 %v1411_v36, %v1411_v36  ;;  %v133_v43 = vmul.f32 %v1413_v37, %v1413_v37 }
  0x97   :  { %v1419_v44 = vsub.f32 %v34_v2, %v100_v40  ;;  %v1421_v45 = vsub.f32 %v36_v5, %v102_v41  ;;  %v147_v46 = vsel %vm49_vm0, %v131_v42, 0.0  ;;  %v153_v49 = vsel %vm49_vm0, %v133_v43, 0.0 }
  0x98   :  { %148 = vadd.xlane.f32.xlu0 %v147_v46  ;;  %v64_v47 = vpop.xlane.xlu0 %63  ;;  %v67_v48 = vpop.xlane.xlu1 %66 }
  0x99   :  { %v103_v50 = vmul.f32 0.041666668, %v64_v47  ;;  %v104_v51 = vmul.f32 0.041666668, %v67_v48  ;;  %v132_v52 = vmul.f32 %v1419_v44, %v1419_v44  ;;  %v134_v53 = vmul.f32 %v1421_v45, %v1421_v45 }
  0x9b   :  { %v1429_v54 = vsub.f32 %v37_v8, %v103_v50  ;;  %v1431_v55 = vsub.f32 %v38_v9, %v104_v51  ;;  %v150_v56 = vsel %vm49_vm0, %v132_v52, 0.0  ;;  %v156_v59 = vsel %vm49_vm0, %v134_v53, 0.0  ;;  %v1220_v53 = vld [vmem:[%s1720_s1 + $0x8] ss:$0 sps:$4 sm:$0xff]  }
  0x9c   :  { %154 = vadd.xlane.f32.xlu0 %v153_v49  ;;  %151 = vadd.xlane.f32.xlu1 %v150_v56  ;;  %v70_v57 = vpop.xlane.xlu0 %69  ;;  %v73_v58 = vpop.xlane.xlu1 %72  ;;  %v312_v56 = vsel %vm310_vm1, %v1220_v53, 0 }
  0x9d   :  { %v105_v60 = vmul.f32 0.041666668, %v70_v57  ;;  %v106_v61 = vmul.f32 0.041666668, %v73_v58  ;;  %v135_v62 = vmul.f32 %v1429_v54, %v1429_v54  ;;  %v136_v63 = vmul.f32 %v1431_v55, %v1431_v55  ;;  %v1221_v57 = vld [vmem:[%s1721_s3] sm:$0xff]   ;;  %v1222_v58 = vld [vmem:[%s1721_s3 + $0x8] sm:$0xff]  }
  0x9e   :  { %1138 = vmatprep.subr.bf16.mxu1 %v1221_v57 }
  0x9f   :  { %v1440_v0 = vsub.f32 %v1344_v12, %v105_v60  ;;  %v1443_v1 = vsub.f32 %v1349_v13, %v106_v61  ;;  %v159_v2 = vsel %vm49_vm0, %v135_v62, 0.0  ;;  %v162_v5 = vsel %vm49_vm0, %v136_v63, 0.0  ;;  %1139 = vmatpush3.bf16.msra.mxu1 %v1221_v57  ;;  %v1224_v60 = vld [vmem:[%s1721_s3 + $0x18] sm:$0xff]   ;;  %v1225_v61 = vld [vmem:[%s1721_s3 + $0x20] sm:$0xff]  }
  0xa0   :  { %157 = vadd.xlane.f32.xlu1 %v156_v59  ;;  %160 = vadd.xlane.f32.xlu0 %v159_v2  ;;  %v76_v3 = vpop.xlane.xlu0 %75  ;;  %v79_v4 = vpop.xlane.xlu1 %78  ;;  %v1223_v59 = vld [vmem:[%s1721_s3 + $0x10] sm:$0xff]  }
  0xa1   :  { %v107_v6 = vmul.f32 0.041666668, %v76_v3  ;;  %v108_v7 = vmul.f32 0.041666668, %v79_v4  ;;  %v137_v8 = vmul.f32 %v1440_v0, %v1440_v0  ;;  %v138_v9 = vmul.f32 %v1443_v1, %v1443_v1  ;;  %1140 = vmatprep.subr.bf16.mxu1 %v1222_v58 }
  0xa3   :  { %v1452_v10 = vsub.f32 %v1358_v16, %v107_v6  ;;  %v1455_v11 = vsub.f32 %v1363_v17, %v108_v7  ;;  %v165_v12 = vsel %vm49_vm0, %v137_v8, 0.0  ;;  %v168_v15 = vsel %vm49_vm0, %v138_v9, 0.0  ;;  %1141 = vmatpush3.bf16.msra.mxu1 %v1222_v58 }
  0xa4   :  { %163 = vadd.xlane.f32.xlu1 %v162_v5  ;;  %166 = vadd.xlane.f32.xlu0 %v165_v12  ;;  %v82_v13 = vpop.xlane.xlu0 %81  ;;  %v85_v14 = vpop.xlane.xlu1 %84 }
  0xa5   :  { %v109_v18 = vmul.f32 0.041666668, %v82_v13  ;;  %v110_v19 = vmul.f32 0.041666668, %v85_v14  ;;  %v139_v22 = vmul.f32 %v1452_v10, %v1452_v10  ;;  %v140_v16 = vmul.f32 %v1455_v11, %v1455_v11  ;;  %1142 = vmatprep.subr.bf16.mxu1 %v1223_v59 }
  0xa7   :  { %v1464_v23 = vsub.f32 %v1372_v20, %v109_v18  ;;  %v1467_v17 = vsub.f32 %v1377_v21, %v110_v19  ;;  %v171_v26 = vsel %vm49_vm0, %v139_v22, 0.0  ;;  %v174_v31 = vsel %vm49_vm0, %v140_v16, 0.0  ;;  %1143 = vmatpush3.bf16.msra.mxu1 %v1223_v59 }
  0xa8   :  { %169 = vadd.xlane.f32.xlu1 %v168_v15  ;;  %172 = vadd.xlane.f32.xlu0 %v171_v26  ;;  %v88_v27 = vpop.xlane.xlu0 %87  ;;  %v91_v30 = vpop.xlane.xlu1 %90 }
  0xa9   :  { %v111_v32 = vmul.f32 0.041666668, %v88_v27  ;;  %v112_v33 = vmul.f32 0.041666668, %v91_v30  ;;  %v141_v34 = vmul.f32 %v1464_v23, %v1464_v23  ;;  %v142_v20 = vmul.f32 %v1467_v17, %v1467_v17  ;;  %1144 = vmatprep.subr.bf16.mxu1 %v1224_v60 }
  0xab   :  { %v1476_v35 = vsub.f32 %v1386_v24, %v111_v32  ;;  %v1479_v21 = vsub.f32 %v1391_v25, %v112_v33  ;;  %v177_v38 = vsel %vm49_vm0, %v141_v34, 0.0  ;;  %v180_v41 = vsel %vm49_vm0, %v142_v20, 0.0  ;;  %1145 = vmatpush3.bf16.msra.mxu1 %v1224_v60 }
  0xac   :  { %175 = vadd.xlane.f32.xlu1 %v174_v31  ;;  %178 = vadd.xlane.f32.xlu0 %v177_v38  ;;  %v94_v39 = vpop.xlane.xlu0 %93  ;;  %v97_v40 = vpop.xlane.xlu1 %96 }
  0xad   :  { %v113_v42 = vmul.f32 0.041666668, %v94_v39  ;;  %v114_v43 = vmul.f32 0.041666668, %v97_v40  ;;  %v143_v46 = vmul.f32 %v1476_v35, %v1476_v35  ;;  %v144_v24 = vmul.f32 %v1479_v21, %v1479_v21  ;;  %1146 = vmatprep.subr.bf16.mxu1 %v1225_v61 }
  0xaf   :  { %v1488_v47 = vsub.f32 %v1400_v28, %v113_v42  ;;  %v1491_v25 = vsub.f32 %v1405_v29, %v114_v43  ;;  %v183_v48 = vsel %vm49_vm0, %v143_v46, 0.0  ;;  %v186_v49 = vsel %vm49_vm0, %v144_v24, 0.0  ;;  %v1219_v29 = vld [vmem:[%s1720_s1] sm:$0xff]   ;;  %1147 = vmatpush3.bf16.msra.mxu1 %v1225_v61 }
  0xb0   :  { %181 = vadd.xlane.f32.xlu1 %v180_v41  ;;  %184 = vadd.xlane.f32.xlu0 %v183_v48 }
  0xb1   :  { %v145_v50 = vmul.f32 %v1488_v47, %v1488_v47  ;;  %v146_v51 = vmul.f32 %v1491_v25, %v1491_v25  ;;  %1118 = vmatprep.subr.bf16.mxu0 %v1219_v29 }
  0xb2   :  { %1119 = vmatpush3.bf16.msra.mxu0 %v1219_v29 }
  0xb3   :  { %v189_v52 = vsel %vm49_vm0, %v145_v50, 0.0  ;;  %v192_v28 = vsel %vm49_vm0, %v146_v51, 0.0  ;;  %1218 = vmatprep.subr.msk.bf16.mxu0 %vm310_vm1, %v1220_v53 }
  0xb4   :  { %187 = vadd.xlane.f32.xlu1 %v186_v49  ;;  %190 = vadd.xlane.f32.xlu0 %v189_v52 }
  0xb6   :  { %1121 = vmatpush3.bf16.msra.mxu0 %v312_v56 }
  0xb8   :  { %193 = vadd.xlane.f32.xlu1 %v192_v28 }
 0x125   :  { %v149_v62 = vpop.xlane.xlu0 %148 }
 0x126   :  { %v195_v63 = vmul.f32 0.041666668, %v149_v62 }
 0x128   :  { %v211_v2 = vadd.f32 1e-05, %v195_v63 }
 0x129   :  { %v152_v3 = vpop.xlane.xlu1 %151  ;;  %v155_v4 = vpop.xlane.xlu0 %154 }
 0x12a   :  { %v196_v5 = vmul.f32 0.041666668, %v152_v3  ;;  %v197_v6 = vmul.f32 0.041666668, %v155_v4  ;;  %1235 = vrsqrt.f32 %v211_v2 }
 0x12c   :  { %v212_v7 = vadd.f32 1e-05, %v196_v5  ;;  %v213_v8 = vadd.f32 1e-05, %v197_v6 }
 0x12d   :  { %v158_v9 = vpop.xlane.xlu1 %157  ;;  %v161_v12 = vpop.xlane.xlu0 %160 }
 0x12e   :  { %1237 = vrsqrt.f32 %v212_v7  ;;  %v198_v13 = vmul.f32 0.041666668, %v158_v9  ;;  %v199_v14 = vmul.f32 0.041666668, %v161_v12 }
 0x12f   :  { %1239 = vrsqrt.f32 %v213_v8 }
 0x130   :  { %v214_v15 = vadd.f32 1e-05, %v198_v13  ;;  %v215_v18 = vadd.f32 1e-05, %v199_v14 }
 0x131   :  { %v164_v19 = vpop.xlane.xlu1 %163  ;;  %v167_v22 = vpop.xlane.xlu0 %166 }
 0x132   :  { %1241 = vrsqrt.f32 %v214_v15  ;;  %v200_v16 = vmul.f32 0.041666668, %v164_v19  ;;  %v201_v26 = vmul.f32 0.041666668, %v167_v22 }
 0x133   :  { %1243 = vrsqrt.f32 %v215_v18 }
 0x134   :  { %v216_v27 = vadd.f32 1e-05, %v200_v16  ;;  %v217_v30 = vadd.f32 1e-05, %v201_v26  ;;  %v1236_v33 = vpop.eup %1235 }
 0x135   :  { %v170_v31 = vpop.xlane.xlu1 %169  ;;  %v173_v32 = vpop.xlane.xlu0 %172  ;;  %v243_v43 = vmul.f32 %v1236_v33, %v1411_v36 }
 0x136   :  { %1245 = vrsqrt.f32 %v216_v27  ;;  %v202_v34 = vmul.f32 0.041666668, %v170_v31  ;;  %v203_v20 = vmul.f32 0.041666668, %v173_v32 }
 0x137   :  { %1247 = vrsqrt.f32 %v217_v30 }
 0x138   :  { %v1238_v38 = vpop.eup %1237  ;;  %v218_v39 = vadd.f32 1e-05, %v202_v34  ;;  %v219_v40 = vadd.f32 1e-05, %v203_v20 }
 0x139   :  { %v176_v41 = vpop.xlane.xlu1 %175  ;;  %v179_v42 = vpop.xlane.xlu0 %178  ;;  %v244_v46 = vmul.f32 %v1238_v38, %v1419_v44 }
 0x13a   :  { %v1240_v24 = vpop.eup %1239  ;;  %1249 = vrsqrt.f32 %v218_v39  ;;  %v204_v48 = vmul.f32 0.041666668, %v176_v41  ;;  %v205_v49 = vmul.f32 0.041666668, %v179_v42  ;;  %v1231_v41 = vld [vmem:[%s1722_s5 + $0x10] sm:$0xff]  }
 0x13b   :  { %v259_v50 = vpack.c.bf16 %v244_v46, %v243_v43  ;;  %1251 = vrsqrt.f32 %v219_v40  ;;  %v245_v56 = vmul.f32 %v1240_v24, %v1413_v37  ;;  %v1567_v42 = vld [vmem:[%s1723_s2] ss:$0 sm:$0xff] }
 0x13c   :  { %v1242_v51 = vpop.eup %1241  ;;  %v220_v52 = vadd.f32 1e-05, %v204_v48  ;;  %v221_v28 = vadd.f32 1e-05, %v205_v49 }
 0x13d   :  { %v182_v29 = vpop.xlane.xlu1 %181  ;;  %1122 = vmatprep.mubr.msk.bf16.mxu0 %vm49_vm0, %v259_v50  ;;  %v185_v53 = vpop.xlane.xlu0 %184  ;;  %v246_v57 = vmul.f32 %v1242_v51, %v1421_v45 }
 0x13e   :  { %v1244_v36 = vpop.eup %1243  ;;  %1253 = vrsqrt.f32 %v220_v52  ;;  %v206_v44 = vmul.f32 0.041666668, %v182_v29  ;;  %v207_v58 = vmul.f32 0.041666668, %v185_v53 }
 0x13f   :  { %v260_v59 = vpack.c.bf16 %v246_v57, %v245_v56  ;;  %1255 = vrsqrt.f32 %v221_v28  ;;  %v247_v3 = vmul.f32 %v1244_v36, %v1429_v54 }
 0x140   :  { %v1246_v60 = vpop.eup %1245  ;;  %v222_v61 = vadd.f32 1e-05, %v206_v44  ;;  %v223_v62 = vadd.f32 1e-05, %v207_v58 }
 0x141   :  { %v188_v63 = vpop.xlane.xlu1 %187  ;;  %1123 = vmatmul.mubr.msk.bf16.vlgmr.msra.gmra.mrb[0].mxu0 %vm49_vm0, %v260_v59  ;;  %v191_v2 = vpop.xlane.xlu0 %190  ;;  %v248_v4 = vmul.f32 %v1246_v60, %v1431_v55 }
 0x142   :  { %v1248_v37 = vpop.eup %1247  ;;  %1257 = vrsqrt.f32 %v222_v61  ;;  %v208_v45 = vmul.f32 0.041666668, %v188_v63  ;;  %v209_v5 = vmul.f32 0.041666668, %v191_v2 }
 0x143   :  { %v261_v6 = vpack.c.bf16 %v248_v4, %v247_v3  ;;  %1259 = vrsqrt.f32 %v223_v62  ;;  %v249_v13 = vmul.f32 %v1248_v37, %v1440_v0 }
 0x144   :  { %v1250_v7 = vpop.eup %1249  ;;  %v224_v8 = vadd.f32 1e-05, %v208_v45  ;;  %v225_v9 = vadd.f32 1e-05, %v209_v5 }
 0x145   :  { %v194_v12 = vpop.xlane.xlu1 %193  ;;  %1126 = vmatprep.mubr.msk.bf16.mxu0 %vm49_vm0, %v261_v6  ;;  %v250_v14 = vmul.f32 %v1250_v7, %v1443_v1  ;;  %v1252_v15 = vpop.eup %1251 }
 0x146   :  { %1261 = vrsqrt.f32 %v224_v8  ;;  %v210_v54 = vmul.f32 0.041666668, %v194_v12  ;;  %v251_v22 = vmul.f32 %v1252_v15, %v1452_v10 }
 0x147   :  { %v262_v55 = vpack.c.bf16 %v250_v14, %v249_v13  ;;  %1263 = vrsqrt.f32 %v225_v9 }
 0x148   :  { %v1254_v18 = vpop.eup %1253  ;;  %v226_v19 = vadd.f32 1e-05, %v210_v54 }
 0x149   :  { %1127 = vmatmul.mubr.msk.bf16.gmra.mrb[4].mxu0 %vm49_vm0, %v262_v55  ;;  %v252_v16 = vmul.f32 %v1254_v18, %v1455_v11  ;;  %v1256_v26 = vpop.eup %1255 }
 0x14a   :  { %1265 = vrsqrt.f32 %v226_v19  ;;  %v253_v0 = vmul.f32 %v1256_v26, %v1464_v23 }
 0x14b   :  { %v263_v27 = vpack.c.bf16 %v252_v16, %v251_v22 }
 0x14c   :  { %v1258_v30 = vpop.eup %1257 }
 0x14d   :  { %1130 = vmatprep.mubr.msk.bf16.mxu0 %vm49_vm0, %v263_v27  ;;  %v254_v1 = vmul.f32 %v1258_v30, %v1467_v17  ;;  %v1260_v31 = vpop.eup %1259  ;;  %v1226_v17 = vld [vmem:[%s1721_s3 + $0x28] sm:$0xff]  }
 0x14e   :  { %v255_v34 = vmul.f32 %v1260_v31, %v1476_v35  ;;  %1148 = vmatprep.subr.bf16.mxu1 %v1226_v17  ;;  %v1227_v35 = vld [vmem:[%s1721_s3 + $0x30] sm:$0xff]  }
 0x14f   :  { %v264_v32 = vpack.c.bf16 %v254_v1, %v253_v0  ;;  %1149 = vmatpush3.bf16.msra.mxu1 %v1226_v17 }
 0x150   :  { %v1262_v33 = vpop.eup %1261  ;;  %1150 = vmatprep.subr.bf16.mxu1 %v1227_v35 }
 0x151   :  { %1131 = vmatmul.mubr.msk.bf16.gmra.mrb[8].mxu0 %vm49_vm0, %v264_v32  ;;  %v256_v10 = vmul.f32 %v1262_v33, %v1479_v21  ;;  %v1264_v11 = vpop.eup %1263  ;;  %v1228_v21 = vld [vmem:[%s1721_s3 + $0x38] sm:$0xff]  }
 0x152   :  { %v257_v39 = vmul.f32 %v1264_v11, %v1488_v47  ;;  %v1229_v47 = vld [vmem:[%s1722_s5] sm:$0xff]  }
 0x153   :  { %v265_v20 = vpack.c.bf16 %v256_v10, %v255_v34  ;;  %1151 = vmatpush3.bf16.msra.mxu1 %v1227_v35  ;;  %1170 = vmatprep.subr.bf16.mxu0 %v1229_v47 }
 0x154   :  { %v1266_v38 = vpop.eup %1265  ;;  %1152 = vmatprep.subr.bf16.mxu1 %v1228_v21  ;;  %1171 = vmatpush3.bf16.msra.mxu0 %v1229_v47 }
 0x155   :  { %1134 = vmatprep.mubr.msk.bf16.mxu0 %vm49_vm0, %v265_v20  ;;  %v258_v23 = vmul.f32 %v1266_v38, %v1491_v25  ;;  %v1230_v25 = vld [vmem:[%s1722_s5 + $0x8] sm:$0xff]  }
 0x156   :  { %1172 = vmatprep.subr.bf16.mxu0 %v1230_v25 }
 0x157   :  { %v266_v40 = vpack.c.bf16 %v258_v23, %v257_v39  ;;  %1153 = vmatpush3.bf16.msra.mxu1 %v1228_v21 }
 0x158   :  { %1173 = vmatpush3.bf16.msra.mxu0 %v1230_v25 }
 0x159   :  { %1135 = vmatmul.mubr.msk.bf16.gmra.mrb[12].mxu0 %vm49_vm0, %v266_v40  ;;  %1174 = vmatprep.subr.bf16.mxu0 %v1231_v41 }
 0x15c   :  { %1175 = vmatpush3.bf16.msra.mxu0 %v1231_v41 }
 0x214   :  { %v1124_v43 = vpop.f32.mrb[0].mxu0 }
 0x215   :  { %v357_v46 = vadd.f32 %v1124_v43, %v1567_v42  ;;  %v348_v24 = vpop.f32.mrb[1].mxu0 }
 0x216   :  { %v349_v48 = vadd.f32 %v1567_v42, %v348_v24  ;;  %v1125_v49 = vpop.f32.mrb[2].mxu0 }
 0x217   :  { %v413_v50 = vmul.f32 0.1, %v357_v46  ;;  %v360_v51 = vadd.f32 %v1125_v49, %v1567_v42  ;;  %v351_v52 = vpop.f32.mrb[3].mxu0 }
 0x218   :  { %v411_v28 = vmul.f32 0.1, %v349_v48  ;;  %v352_v29 = vadd.f32 %v1567_v42, %v351_v52 }
 0x219   :  { %v414_v53 = vmul.f32 0.1, %v360_v51  ;;  %v429_v57 = vmax.f32 %v357_v46, %v413_v50 }
 0x21a   :  { %v412_v56 = vmul.f32 0.1, %v352_v29  ;;  %v427_v58 = vmax.f32 %v349_v48, %v411_v28 }
 0x21b   :  { %v430_v36 = vmax.f32 %v360_v51, %v414_v53  ;;  %v1594_v53 = vld [vmem:[%s1725_s4] ss:$0 sm:$0xff] }
 0x21c   :  { %v1128_v44 = vpop.f32.mrb[4].mxu0  ;;  %v428_v59 = vmax.f32 %v352_v29, %v412_v56  ;;  %v1232_v29 = vld [vmem:[%s1722_s5 + $0x18] sm:$0xff]  }
 0x21d   :  { %v373_v60 = vadd.f32 %v1128_v44, %v1567_v42  ;;  %v364_v61 = vpop.f32.mrb[5].mxu0  ;;  %v444_v62 = vpack.c.bf16 %v430_v36, %v429_v57  ;;  %1176 = vmatprep.subr.bf16.mxu0 %v1232_v29 }
 0x21e   :  { %v365_v63 = vadd.f32 %v1567_v42, %v364_v61  ;;  %v1129_v2 = vpop.f32.mrb[6].mxu0  ;;  %v443_v3 = vpack.c.bf16 %v428_v59, %v427_v58  ;;  %1177 = vmatpush3.bf16.msra.mxu0 %v1232_v29 }
 0x21f   :  { %v417_v4 = vmul.f32 0.1, %v373_v60  ;;  %v376_v37 = vadd.f32 %v1129_v2, %v1567_v42  ;;  %v367_v45 = vpop.f32.mrb[7].mxu0 }
 0x220   :  { %v415_v5 = vmul.f32 0.1, %v365_v63  ;;  %v368_v6 = vadd.f32 %v1567_v42, %v367_v45  ;;  %1154 = vmatprep.mubr.bf16.mxu1 %v443_v3 }
 0x221   :  { %v418_v7 = vmul.f32 0.1, %v376_v37  ;;  %1155 = vmatmul.mubr.bf16.vlgmr.msra.gmra.mrb[0].mxu1 %v444_v62  ;;  %v433_v9 = vmax.f32 %v373_v60, %v417_v4 }
 0x222   :  { %v416_v8 = vmul.f32 0.1, %v368_v6  ;;  %v431_v13 = vmax.f32 %v365_v63, %v415_v5 }
 0x223   :  { %v434_v12 = vmax.f32 %v376_v37, %v418_v7 }
 0x224   :  { %v432_v14 = vmax.f32 %v368_v6, %v416_v8  ;;  %v1132_v15 = vpop.f32.mrb[8].mxu0 }
 0x225   :  { %v389_v54 = vadd.f32 %v1132_v15, %v1567_v42  ;;  %v380_v55 = vpop.f32.mrb[9].mxu0  ;;  %v446_v18 = vpack.c.bf16 %v434_v12, %v433_v9 }
 0x226   :  { %v381_v19 = vadd.f32 %v1567_v42, %v380_v55  ;;  %v1133_v22 = vpop.f32.mrb[10].mxu0  ;;  %v445_v16 = vpack.c.bf16 %v432_v14, %v431_v13 }
 0x227   :  { %v421_v26 = vmul.f32 0.1, %v389_v54  ;;  %v392_v27 = vadd.f32 %v1133_v22, %v1567_v42  ;;  %v383_v30 = vpop.f32.mrb[11].mxu0 }
 0x228   :  { %v419_v0 = vmul.f32 0.1, %v381_v19  ;;  %v384_v1 = vadd.f32 %v1567_v42, %v383_v30  ;;  %1158 = vmatprep.mubr.bf16.mxu1 %v445_v16 }
 0x229   :  { %v422_v31 = vmul.f32 0.1, %v392_v27  ;;  %1159 = vmatmul.mubr.bf16.gmra.mrb[4].mxu1 %v446_v18  ;;  %v437_v33 = vmax.f32 %v389_v54, %v421_v26 }
 0x22a   :  { %v420_v32 = vmul.f32 0.1, %v384_v1  ;;  %v435_v10 = vmax.f32 %v381_v19, %v419_v0 }
 0x22b   :  { %v438_v34 = vmax.f32 %v392_v27, %v422_v31 }
 0x22c   :  { %v436_v11 = vmax.f32 %v384_v1, %v420_v32  ;;  %v1136_v20 = vpop.f32.mrb[12].mxu0 }
 0x22d   :  { %v405_v38 = vadd.f32 %v1136_v20, %v1567_v42  ;;  %v396_v39 = vpop.f32.mrb[13].mxu0  ;;  %v448_v23 = vpack.c.bf16 %v438_v34, %v437_v33 }
 0x22e   :  { %v397_v40 = vadd.f32 %v1567_v42, %v396_v39  ;;  %v1137_v17 = vpop.f32.mrb[14].mxu0  ;;  %v447_v35 = vpack.c.bf16 %v436_v11, %v435_v10 }
 0x22f   :  { %v425_v21 = vmul.f32 0.1, %v405_v38  ;;  %v408_v47 = vadd.f32 %v1137_v17, %v1567_v42  ;;  %v399_v25 = vpop.f32.mrb[15].mxu0 }
 0x230   :  { %v423_v41 = vmul.f32 0.1, %v397_v40  ;;  %v400_v43 = vadd.f32 %v1567_v42, %v399_v25  ;;  %1162 = vmatprep.mubr.bf16.mxu1 %v447_v35  ;;  %v1233_v42 = vld [vmem:[%s1724_s7] sm:$0xff]  }
 0x231   :  { %v426_v46 = vmul.f32 0.1, %v408_v47  ;;  %1163 = vmatmul.mubr.bf16.gmra.mrb[8].mxu1 %v448_v23  ;;  %v441_v48 = vmax.f32 %v405_v38, %v425_v21  ;;  %1214 = vmatprep.subr.bf16.mxu1 %v1233_v42 }
 0x232   :  { %v424_v24 = vmul.f32 0.1, %v400_v43  ;;  %v439_v50 = vmax.f32 %v397_v40, %v423_v41  ;;  %1194 = vmatprep.subr.bf16.mxu0 %v1233_v42  ;;  %1216 = vmatpush3.bf16.msra.mxu1 %v1233_v42 }
 0x233   :  { %v442_v49 = vmax.f32 %v408_v47, %v426_v46 }
 0x234   :  { %v440_v51 = vmax.f32 %v400_v43, %v424_v24 }
 0x235   :  { %v450_v52 = vpack.c.bf16 %v442_v49, %v441_v48 }
 0x236   :  { %v449_v28 = vpack.c.bf16 %v440_v51, %v439_v50 }
 0x238   :  { %1166 = vmatprep.mubr.bf16.mxu1 %v449_v28 }
 0x239   :  { %1167 = vmatmul.mubr.bf16.gmra.mrb[12].mxu1 %v450_v52 }
 0x2f4   :  { %v1156_v56 = vpop.f32.mrb[0].mxu1 }
 0x2f5   :  { %v565_v57 = vadd.f32 %v1156_v56, %v1594_v53  ;;  %v556_v36 = vpop.f32.mrb[1].mxu1 }
 0x2f6   :  { %v557_v44 = vadd.f32 %v1594_v53, %v556_v36  ;;  %v1157_v58 = vpop.f32.mrb[2].mxu1 }
 0x2f7   :  { %v621_v59 = vmul.f32 0.1, %v565_v57  ;;  %v568_v60 = vadd.f32 %v1157_v58, %v1594_v53  ;;  %v559_v61 = vpop.f32.mrb[3].mxu1 }
 0x2f8   :  { %v619_v62 = vmul.f32 0.1, %v557_v44  ;;  %v560_v63 = vadd.f32 %v1594_v53, %v559_v61 }
 0x2f9   :  { %v622_v2 = vmul.f32 0.1, %v568_v60  ;;  %v637_v4 = vmax.f32 %v565_v57, %v621_v59 }
 0x2fa   :  { %v620_v3 = vmul.f32 0.1, %v560_v63  ;;  %v635_v45 = vmax.f32 %v557_v44, %v619_v62 }
 0x2fb   :  { %v638_v37 = vmax.f32 %v568_v60, %v622_v2 }
 0x2fc   :  { %v636_v5 = vmax.f32 %v560_v63, %v620_v3  ;;  %v1160_v6 = vpop.f32.mrb[4].mxu1  ;;  %v1626_v63 = vld [vmem:[%s1726_s6] ss:$0 sm:$0xff] }
 0x2fd   :  { %v652_v7 = vpack.c.bf16 %v638_v37, %v637_v4  ;;  %v581_v8 = vadd.f32 %v1160_v6, %v1594_v53  ;;  %v572_v9 = vpop.f32.mrb[5].mxu1 }
 0x2fe   :  { %v651_v12 = vpack.c.bf16 %v636_v5, %v635_v45  ;;  %v573_v13 = vadd.f32 %v1594_v53, %v572_v9  ;;  %v1161_v14 = vpop.f32.mrb[6].mxu1 }
 0x2ff   :  { %v625_v15 = vmul.f32 0.1, %v581_v8  ;;  %v584_v54 = vadd.f32 %v1161_v14, %v1594_v53  ;;  %v575_v55 = vpop.f32.mrb[7].mxu1 }
 0x300   :  { %v623_v18 = vmul.f32 0.1, %v573_v13  ;;  %v576_v19 = vadd.f32 %v1594_v53, %v575_v55  ;;  %1178 = vmatprep.mubr.msk.bf16.mxu0 %vm698_vm2, %v651_v12 }
 0x301   :  { %v626_v22 = vmul.f32 0.1, %v584_v54  ;;  %1179 = vmatmul.mubr.msk.bf16.vlgmr.msra.gmra.mrb[16].mxu0 %vm698_vm2, %v652_v7  ;;  %v641_v26 = vmax.f32 %v581_v8, %v625_v15 }
 0x302   :  { %v624_v16 = vmul.f32 0.1, %v576_v19  ;;  %1195 = vmatpush3.bf16.msra.mxu0 %v1233_v42  ;;  %v639_v30 = vmax.f32 %v573_v13, %v623_v18 }
 0x303   :  { %v642_v27 = vmax.f32 %v584_v54, %v626_v22 }
 0x304   :  { %v640_v0 = vmax.f32 %v576_v19, %v624_v16  ;;  %v1164_v1 = vpop.f32.mrb[8].mxu1 }
 0x305   :  { %v654_v31 = vpack.c.bf16 %v642_v27, %v641_v26  ;;  %v597_v32 = vadd.f32 %v1164_v1, %v1594_v53  ;;  %v588_v33 = vpop.f32.mrb[9].mxu1 }
 0x306   :  { %v653_v34 = vpack.c.bf16 %v640_v0, %v639_v30  ;;  %v589_v10 = vadd.f32 %v1594_v53, %v588_v33  ;;  %v1165_v11 = vpop.f32.mrb[10].mxu1 }
 0x307   :  { %v629_v20 = vmul.f32 0.1, %v597_v32  ;;  %v600_v38 = vadd.f32 %v1165_v11, %v1594_v53  ;;  %v591_v39 = vpop.f32.mrb[11].mxu1 }
 0x308   :  { %v627_v23 = vmul.f32 0.1, %v589_v10  ;;  %v592_v40 = vadd.f32 %v1594_v53, %v591_v39  ;;  %1182 = vmatprep.mubr.msk.bf16.mxu0 %vm698_vm2, %v653_v34 }
 0x309   :  { %v630_v17 = vmul.f32 0.1, %v600_v38  ;;  %1183 = vmatmul.mubr.msk.bf16.gmra.mrb[20].mxu0 %vm698_vm2, %v654_v31  ;;  %v645_v21 = vmax.f32 %v597_v32, %v629_v20 }
 0x30a   :  { %v628_v35 = vmul.f32 0.1, %v592_v40  ;;  %v643_v25 = vmax.f32 %v589_v10, %v627_v23 }
 0x30b   :  { %v646_v47 = vmax.f32 %v600_v38, %v630_v17 }
 0x30c   :  { %v644_v41 = vmax.f32 %v592_v40, %v628_v35  ;;  %v1168_v43 = vpop.f32.mrb[12].mxu1 }
 0x30d   :  { %v656_v46 = vpack.c.bf16 %v646_v47, %v645_v21  ;;  %v613_v24 = vadd.f32 %v1168_v43, %v1594_v53  ;;  %v604_v48 = vpop.f32.mrb[13].mxu1 }
 0x30e   :  { %v655_v49 = vpack.c.bf16 %v644_v41, %v643_v25  ;;  %v605_v50 = vadd.f32 %v1594_v53, %v604_v48  ;;  %v1169_v51 = vpop.f32.mrb[14].mxu1 }
 0x30f   :  { %v633_v52 = vmul.f32 0.1, %v613_v24  ;;  %v616_v28 = vadd.f32 %v1169_v51, %v1594_v53  ;;  %v607_v29 = vpop.f32.mrb[15].mxu1 }
 0x310   :  { %v631_v42 = vmul.f32 0.1, %v605_v50  ;;  %v608_v56 = vadd.f32 %v1594_v53, %v607_v29  ;;  %1186 = vmatprep.mubr.msk.bf16.mxu0 %vm698_vm2, %v655_v49  ;;  %v1234_v53 = vld [vmem:[%s1724_s7 + $0x8] sm:$0xff]  }
 0x311   :  { %v634_v57 = vmul.f32 0.1, %v616_v28  ;;  %1187 = vmatmul.mubr.msk.bf16.gmra.mrb[24].mxu0 %vm698_vm2, %v656_v46  ;;  %v649_v44 = vmax.f32 %v613_v24, %v633_v52  ;;  %1215 = vmatprep.subr.bf16.mxu1 %v1234_v53 }
 0x312   :  { %v632_v36 = vmul.f32 0.1, %v608_v56  ;;  %v647_v59 = vmax.f32 %v605_v50, %v631_v42  ;;  %1196 = vmatprep.subr.bf16.mxu0 %v1234_v53  ;;  %1217 = vmatpush3.bf16.msra.mxu1 %v1234_v53 }
 0x313   :  { %v650_v58 = vmax.f32 %v616_v28, %v634_v57  ;;  %1197 = vmatpush3.bf16.msra.mxu0 %v1234_v53 }
 0x314   :  { %v648_v60 = vmax.f32 %v608_v56, %v632_v36 }
 0x315   :  { %v658_v61 = vpack.c.bf16 %v650_v58, %v649_v44 }
 0x316   :  { %v657_v62 = vpack.c.bf16 %v648_v60, %v647_v59 }
 0x318   :  { %1190 = vmatprep.mubr.msk.bf16.mxu0 %vm698_vm2, %v657_v62 }
 0x319   :  { %1191 = vmatmul.mubr.msk.bf16.gmra.mrb[28].mxu0 %vm698_vm2, %v658_v61 }
 0x3d4   :  { %v1180_v2 = vpop.f32.mrb[16].mxu0 }
 0x3d5   :  { %v766_v3 = vadd.f32 %v1180_v2, %v1626_v63  ;;  %v757_v4 = vpop.f32.mrb[17].mxu0 }
 0x3d6   :  { %v758_v37 = vadd.f32 %v1626_v63, %v757_v4  ;;  %v1181_v45 = vpop.f32.mrb[18].mxu0 }
 0x3d7   :  { %v822_v5 = vmul.f32 0.1, %v766_v3  ;;  %v769_v6 = vadd.f32 %v1181_v45, %v1626_v63  ;;  %v760_v7 = vpop.f32.mrb[19].mxu0 }
 0x3d8   :  { %v820_v8 = vmul.f32 0.1, %v758_v37  ;;  %v761_v9 = vadd.f32 %v1626_v63, %v760_v7 }
 0x3d9   :  { %v823_v12 = vmul.f32 0.1, %v769_v6  ;;  %v838_v14 = vmax.f32 %v766_v3, %v822_v5 }
 0x3da   :  { %v821_v13 = vmul.f32 0.1, %v761_v9  ;;  %v836_v54 = vmax.f32 %v758_v37, %v820_v8 }
 0x3db   :  { %v839_v15 = vmax.f32 %v769_v6, %v823_v12 }
 0x3dc   :  { %v837_v55 = vmax.f32 %v761_v9, %v821_v13  ;;  %v1184_v18 = vpop.f32.mrb[20].mxu0 }
 0x3dd   :  { %v853_v19 = vpack.c.bf16 %v839_v15, %v838_v14  ;;  %v782_v22 = vadd.f32 %v1184_v18, %v1626_v63  ;;  %v773_v16 = vpop.f32.mrb[21].mxu0 }
 0x3de   :  { %v852_v26 = vpack.c.bf16 %v837_v55, %v836_v54  ;;  %v774_v27 = vadd.f32 %v1626_v63, %v773_v16  ;;  %v1185_v30 = vpop.f32.mrb[22].mxu0 }
 0x3df   :  { %v826_v0 = vmul.f32 0.1, %v782_v22  ;;  %v785_v1 = vadd.f32 %v1185_v30, %v1626_v63  ;;  %v776_v31 = vpop.f32.mrb[23].mxu0 }
 0x3e0   :  { %v824_v32 = vmul.f32 0.1, %v774_v27  ;;  %v777_v33 = vadd.f32 %v1626_v63, %v776_v31  ;;  %1198 = vmatprep.mubr.msk.bf16.mxu0 %vm883_vm3, %v852_v26 }
 0x3e1   :  { %v827_v34 = vmul.f32 0.1, %v785_v1  ;;  %1199 = vmatmul.mubr.msk.bf16.vlgmr.msra.gmra.mrb[32].mxu0 %vm883_vm3, %v853_v19  ;;  %v842_v11 = vmax.f32 %v782_v22, %v826_v0 }
 0x3e2   :  { %v825_v10 = vmul.f32 0.1, %v777_v33  ;;  %v840_v38 = vmax.f32 %v774_v27, %v824_v32 }
 0x3e3   :  { %v843_v20 = vmax.f32 %v785_v1, %v827_v34 }
 0x3e4   :  { %v841_v39 = vmax.f32 %v777_v33, %v825_v10  ;;  %v1188_v23 = vpop.f32.mrb[24].mxu0 }
 0x3e5   :  { %v855_v40 = vpack.c.bf16 %v843_v20, %v842_v11  ;;  %v798_v17 = vadd.f32 %v1188_v23, %v1626_v63  ;;  %v789_v35 = vpop.f32.mrb[25].mxu0 }
 0x3e6   :  { %v854_v21 = vpack.c.bf16 %v841_v39, %v840_v38  ;;  %v790_v47 = vadd.f32 %v1626_v63, %v789_v35  ;;  %v1189_v25 = vpop.f32.mrb[26].mxu0 }
 0x3e7   :  { %v830_v41 = vmul.f32 0.1, %v798_v17  ;;  %v801_v43 = vadd.f32 %v1189_v25, %v1626_v63  ;;  %v792_v46 = vpop.f32.mrb[27].mxu0 }
 0x3e8   :  { %v828_v24 = vmul.f32 0.1, %v790_v47  ;;  %v793_v48 = vadd.f32 %v1626_v63, %v792_v46  ;;  %1202 = vmatprep.mubr.msk.bf16.mxu1 %vm883_vm3, %v854_v21 }
 0x3e9   :  { %v831_v49 = vmul.f32 0.1, %v801_v43  ;;  %1203 = vmatmul.mubr.msk.bf16.vlgmr.msra.gmra.mrb[16].mxu1 %vm883_vm3, %v855_v40  ;;  %v846_v51 = vmax.f32 %v798_v17, %v830_v41 }
 0x3ea   :  { %v829_v50 = vmul.f32 0.1, %v793_v48  ;;  %v844_v28 = vmax.f32 %v790_v47, %v828_v24 }
 0x3eb   :  { %v847_v52 = vmax.f32 %v801_v43, %v831_v49 }
 0x3ec   :  { %v845_v29 = vmax.f32 %v793_v48, %v829_v50  ;;  %v1192_v42 = vpop.f32.mrb[28].mxu0 }
 0x3ed   :  { %v857_v56 = vpack.c.bf16 %v847_v52, %v846_v51  ;;  %v814_v57 = vadd.f32 %v1192_v42, %v1626_v63  ;;  %v805_v36 = vpop.f32.mrb[29].mxu0 }
 0x3ee   :  { %v856_v44 = vpack.c.bf16 %v845_v29, %v844_v28  ;;  %v806_v58 = vadd.f32 %v1626_v63, %v805_v36  ;;  %v1193_v59 = vpop.f32.mrb[30].mxu0 }
 0x3ef   :  { %v834_v60 = vmul.f32 0.1, %v814_v57  ;;  %v817_v61 = vadd.f32 %v1193_v59, %v1626_v63  ;;  %v808_v62 = vpop.f32.mrb[31].mxu0 }
 0x3f0   :  { %v832_v53 = vmul.f32 0.1, %v806_v58  ;;  %v809_v2 = vadd.f32 %v1626_v63, %v808_v62  ;;  %1206 = vmatprep.mubr.msk.bf16.mxu1 %vm883_vm3, %v856_v44  ;;  %v1059_v63 = vld [vmem:[%s1727_s8] ss:$0 sm:$0xff] }
 0x3f1   :  { %v835_v3 = vmul.f32 0.1, %v817_v61  ;;  %1207 = vmatmul.mubr.msk.bf16.gmra.mrb[20].mxu1 %vm883_vm3, %v857_v56  ;;  %v850_v37 = vmax.f32 %v814_v57, %v834_v60 }
 0x3f2   :  { %v833_v4 = vmul.f32 0.1, %v809_v2  ;;  %v848_v5 = vmax.f32 %v806_v58, %v832_v53 }
 0x3f3   :  { %v851_v45 = vmax.f32 %v817_v61, %v835_v3 }
 0x3f4   :  { %v849_v6 = vmax.f32 %v809_v2, %v833_v4 }
 0x3f5   :  { %v859_v7 = vpack.c.bf16 %v851_v45, %v850_v37 }
 0x3f6   :  { %v858_v8 = vpack.c.bf16 %v849_v6, %v848_v5 }
 0x3f8   :  { %1210 = vmatprep.mubr.msk.bf16.mxu1 %vm883_vm3, %v858_v8 }
 0x3f9   :  { %1211 = vmatmul.mubr.msk.bf16.gmra.mrb[24].mxu1 %vm883_vm3, %v859_v7 }
 0x4b4   :  { %v1200_v9 = vpop.f32.mrb[32].mxu0 }
 0x4b5   :  { %v951_v12 = vadd.f32 %v1200_v9, %v1059_v63  ;;  %v942_v13 = vpop.f32.mrb[33].mxu0 }
 0x4b6   :  { %v943_v14 = vadd.f32 %v1059_v63, %v942_v13  ;;  %v1201_v15 = vpop.f32.mrb[34].mxu0 }
 0x4b7   :  { %1008 = vst.msk [vmem:[%s1728_s9 + $0x10] sm:$0xff] %vm1005_vm4, %v951_v12  ;;  %v954_v54 = vadd.f32 %v1201_v15, %v1059_v63  ;;  %v945_v55 = vpop.f32.mrb[35].mxu0 }
 0x4b8   :  { %1006 = vst.msk [vmem:[%s1728_s9] sm:$0xff] %vm1005_vm4, %v943_v14  ;;  %v946_v18 = vadd.f32 %v1059_v63, %v945_v55 }
 0x4b9   :  { %1009 = vst.msk [vmem:[%s1728_s9 + $0x18] sm:$0xff] %vm1005_vm4, %v954_v54 }
 0x4ba   :  { %1007 = vst.msk [vmem:[%s1728_s9 + $0x8] sm:$0xff] %vm1005_vm4, %v946_v18 }
 0x4bc   :  { %v1204_v19 = vpop.f32.mrb[16].mxu1 }
 0x4bd   :  { %v967_v22 = vadd.f32 %v1204_v19, %v1059_v63  ;;  %v958_v16 = vpop.f32.mrb[17].mxu1 }
 0x4be   :  { %v959_v26 = vadd.f32 %v1059_v63, %v958_v16  ;;  %v1205_v27 = vpop.f32.mrb[18].mxu1 }
 0x4bf   :  { %1012 = vst.msk [vmem:[%s1728_s9 + $0x30] sm:$0xff] %vm1005_vm4, %v967_v22  ;;  %v970_v30 = vadd.f32 %v1205_v27, %v1059_v63  ;;  %v961_v0 = vpop.f32.mrb[19].mxu1 }
 0x4c0   :  { %1010 = vst.msk [vmem:[%s1728_s9 + $0x20] sm:$0xff] %vm1005_vm4, %v959_v26  ;;  %v962_v1 = vadd.f32 %v1059_v63, %v961_v0 }
 0x4c1   :  { %1013 = vst.msk [vmem:[%s1728_s9 + $0x38] sm:$0xff] %vm1005_vm4, %v970_v30 }
 0x4c2   :  { %1011 = vst.msk [vmem:[%s1728_s9 + $0x28] sm:$0xff] %vm1005_vm4, %v962_v1 }
 0x4c4   :  { %v1208_v31 = vpop.f32.mrb[20].mxu1 }
 0x4c5   :  { %v983_v32 = vadd.f32 %v1208_v31, %v1059_v63  ;;  %v974_v33 = vpop.f32.mrb[21].mxu1 }
 0x4c6   :  { %v975_v34 = vadd.f32 %v1059_v63, %v974_v33  ;;  %v1209_v10 = vpop.f32.mrb[22].mxu1 }
 0x4c7   :  { %1016 = vst.msk [vmem:[%s1728_s9 + $0x50] sm:$0xff] %vm1005_vm4, %v983_v32  ;;  %v986_v11 = vadd.f32 %v1209_v10, %v1059_v63  ;;  %v977_v20 = vpop.f32.mrb[23].mxu1 }
 0x4c8   :  { %1014 = vst.msk [vmem:[%s1728_s9 + $0x40] sm:$0xff] %vm1005_vm4, %v975_v34  ;;  %v978_v38 = vadd.f32 %v1059_v63, %v977_v20 }
 0x4c9   :  { %1017 = vst.msk [vmem:[%s1728_s9 + $0x58] sm:$0xff] %vm1005_vm4, %v986_v11 }
 0x4ca   :  { %1015 = vst.msk [vmem:[%s1728_s9 + $0x48] sm:$0xff] %vm1005_vm4, %v978_v38 }
 0x4cc   :  { %v1212_v39 = vpop.f32.mrb[24].mxu1 }
 0x4cd   :  { %v999_v23 = vadd.f32 %v1212_v39, %v1059_v63  ;;  %v990_v40 = vpop.f32.mrb[25].mxu1 }
 0x4ce   :  { %v991_v17 = vadd.f32 %v1059_v63, %v990_v40  ;;  %v1213_v35 = vpop.f32.mrb[26].mxu1 }
 0x4cf   :  { %1020 = vst.msk [vmem:[%s1728_s9 + $0x70] sm:$0xff] %vm1005_vm4, %v999_v23  ;;  %v1002_v21 = vadd.f32 %v1213_v35, %v1059_v63  ;;  %v993_v47 = vpop.f32.mrb[27].mxu1 }
 0x4d0   :  { %1018 = vst.msk [vmem:[%s1728_s9 + $0x60] sm:$0xff] %vm1005_vm4, %v991_v17  ;;  %v994_v25 = vadd.f32 %v1059_v63, %v993_v47 }
 0x4d1   :  { %1021 = vst.msk [vmem:[%s1728_s9 + $0x78] sm:$0xff] %vm1005_vm4, %v1002_v21 }
 0x4d2   :  { %1019 = vst.msk [vmem:[%s1728_s9 + $0x68] sm:$0xff] %vm1005_vm4, %v994_v25 }

</bundles_post_ra>
